<compile_context>
chip_gen: v5e
topology: v5e:2x2
jax: 0.10.0
libtpu: 0.0.40
codegen_flags: <defaults>
</compile_context>

<pallas_src>
import jax
import jax.numpy as jnp
from jax.experimental import pallas as pl
from jax.experimental.pallas import tpu as pltpu

# ~8 MiB blocks: read+write DMA per block is ~2.6 us on v7x (3.2 TB/s) and
# ~10-20 us on v6e/v5e, so the ~0.35 us per-grid-step overhead stays <7%.
_TARGET_BLOCK_BYTES = 8 * 1024 * 1024
# Double-buffered 2 inputs + 2 outputs at 8 MiB each = 32 MiB; leave headroom.
_VMEM_LIMIT_BYTES = 48 * 1024 * 1024


def _relu_kernel(x_ref, o_ref):
    o_ref[...] = jnp.maximum(x_ref[...], 0)


def relu_pallas(x: jax.Array) -> jax.Array:
    """Elementwise ReLU: max(x, 0), matching torch.max(x, torch.zeros_like(x))."""
    orig_shape = x.shape
    dtype = x.dtype
    n = x.size

    if n == 0:
        return x

    itemsize = jnp.dtype(dtype).itemsize
    x_flat = jnp.ravel(x)

    # Split off the (<128 element) tail so the kernel only ever sees a
    # 128-aligned prefix: no padded copy, no trailing slice of the output.
    n_main = (n // 128) * 128
    if n_main == 0:
        # Tiny input (< 128 elements): not worth a kernel launch.
        return jnp.maximum(x, 0)

    x_main = x_flat[:n_main] if n_main < n else x_flat

    # Widest lane-dense column width (multiple of 128) dividing the aligned
    # prefix exactly. Always succeeds (n_main is a multiple of 128).
    cols = 128
    for c in (8192, 4096, 2048, 1024, 512, 256, 128):
        if n_main % c == 0:
            cols = c
            break
    rows = n_main // cols

    # Dtype-aware sublane multiple: 8 for f32, 16 for bf16, 32 for int8/fp8,
    # so blocks stay well-tiled for packed dtypes too.
    sub = max(8, 32 // itemsize)

    # Byte-budget block sizing: ~8 MiB per block regardless of dtype/cols.
    budget_rows = max(sub, (_TARGET_BLOCK_BYTES // (cols * itemsize)) // sub * sub)

    if rows <= sub:
        # Full row extent (always a legal block shape, even if < 8).
        block_rows = rows
    else:
        block_rows = min(budget_rows, (rows // sub) * sub)
        # Guarantee >= 2 grid steps when the data allows it, so the "parallel"
        # axis can shard across both TensorCores on v7x (one extra ~0.35 us
        # step is noise on single-core chips).
        if pl.cdiv(rows, block_rows) < 2 and rows >= 2 * sub:
            half = ((pl.cdiv(rows, 2) + sub - 1) // sub) * sub
            block_rows = min(block_rows, half)

    grid = (pl.cdiv(rows, block_rows),)
    x2d = x_main.reshape(rows, cols)

    out2d = pl.pallas_call(
        _relu_kernel,
        out_shape=jax.ShapeDtypeStruct((rows, cols), dtype),
        grid_spec=pltpu.PrefetchScalarGridSpec(
            num_scalar_prefetch=0,
            grid=grid,
            in_specs=[pl.BlockSpec((block_rows, cols), lambda i: (i, 0))],
            out_specs=pl.BlockSpec((block_rows, cols), lambda i: (i, 0)),
        ),
        compiler_params=pltpu.CompilerParams(
            dimension_semantics=("parallel",),
            vmem_limit_bytes=_VMEM_LIMIT_BYTES,
        ),
        # ReLU can be done in place; XLA drops the copy when x is dead.
        input_output_aliases={0: 0},
    )(x2d)

    out_flat = out2d.reshape(-1)
    if n_main < n:
        # Rare path (element count not a multiple of 128): handle the short
        # tail on the VPU-free path and stitch it back on.
        tail = jnp.maximum(x_flat[n_main:], 0)
        out_flat = jnp.concatenate([out_flat, tail])
    return out_flat.reshape(orig_shape)

    # TODO(synk): backward (__dsigma(input) * grad) not implemented — forward only.


if __name__ == "__main__":
    key = jax.random.PRNGKey(0)

    # Small NCHW input consistent with how the module would be used in a convnet.
    x = jax.random.normal(key, (2, 4, 16, 16), dtype=jnp.float32)
    y = jax.block_until_ready(relu_pallas(x))
    y_ref = jnp.maximum(x, 0.0)
    assert y.shape == x.shape and y.dtype == x.dtype
    assert jnp.array_equal(y, y_ref), "Pallas ReLU mismatch vs reference"

    k1, k2, k3, k4 = jax.random.split(key, 4)

    # Multi-row lane-dense path.
    x2 = jax.random.normal(k1, (2, 8, 32, 32), dtype=jnp.float32)
    assert jnp.array_equal(jax.block_until_ready(relu_pallas(x2)), jnp.maximum(x2, 0.0))

    # Tiny (<128 elements) pure-jnp path.
    x3 = jax.random.normal(k2, (3, 5, 7), dtype=jnp.float32)
    assert jnp.array_equal(jax.block_until_ready(relu_pallas(x3)), jnp.maximum(x3, 0.0))

    # 128-aligned prefix + short tail path (2563 = 20*128 + 3 elements).
    x4 = jax.random.normal(k3, (2563,), dtype=jnp.float32)
    assert jnp.array_equal(jax.block_until_ready(relu_pallas(x4)), jnp.maximum(x4, 0.0))

    # bf16 path (dtype-aware block sizing).
    x5 = jax.random.normal(k4, (2, 4, 16, 16), dtype=jnp.bfloat16)
    y5 = jax.block_until_ready(relu_pallas(x5))
    assert y5.dtype == jnp.bfloat16
    assert jnp.array_equal(y5, jnp.maximum(x5, jnp.bfloat16(0)))

    print("KERNEL_OK")
</pallas_src>

<mosaic_0001>
module attributes {stable_mosaic.version = 11 : i64} {
  func.func @_relu_kernel(%arg0: i32, %arg1: memref<1x2048xf32, #tpu.memory_space<vmem>>, %arg2: memref<1x2048xf32, #tpu.memory_space<vmem>>) attributes {dimension_semantics = [#tpu.dimension_semantics<parallel>], iteration_bounds = array<i64: 1>, scalar_prefetch = 0 : i64, scratch_operands = 0 : i64, tpu.core_type = #tpu.core_type<tc>, window_params = [{transform_indices = @transform_0, window_bounds = array<i64: 1, 2048>}, {transform_indices = @transform_1, window_bounds = array<i64: 1, 2048>}]} {
    %c0 = arith.constant 0 : index
    %c0_0 = arith.constant 0 : index
    %0 = vector.load %arg1[%c0, %c0_0] : memref<1x2048xf32, #tpu.memory_space<vmem>>, vector<1x2048xf32>
    %cst = arith.constant 0.000000e+00 : f32
    %1 = vector.broadcast %cst : f32 to vector<1x2048xf32>
    %2 = arith.maximumf %0, %1 : vector<1x2048xf32>
    %c0_1 = arith.constant 0 : index
    %c0_2 = arith.constant 0 : index
    %3 = vector.load %arg2[%c0_1, %c0_2] : memref<1x2048xf32, #tpu.memory_space<vmem>>, vector<1x2048xf32>
    tpu.vector_store %arg2[%c0_1, %c0_2], %2 {strides = array<i32>} : memref<1x2048xf32, #tpu.memory_space<vmem>>, vector<1x2048xf32>,
    return
  }
  func.func @transform_0(%arg0: i32) -> (i32, i32) {
    %c0_i32 = arith.constant 0 : i32
    %c0_i32_0 = arith.constant 0 : i32
    return %arg0, %c0_i32 : i32, i32
  }
  func.func @transform_1(%arg0: i32) -> (i32, i32) {
    %c0_i32 = arith.constant 0 : i32
    %c0_i32_0 = arith.constant 0 : i32
    return %arg0, %c0_i32 : i32, i32
  }
}

</mosaic_0001>

<bundles_post_ra>
// kernel: tpu_custom_call.1
= control target key start
LH: loop header
LB: loop body
LE: loop exit
PB: predicated region body
PF: predicated region fallthrough
CT: control target
= control target key end

     0   :  { %6 = vsyncpa [#allocation3], 0  ;;  %s118_s0 = inlined_call_operand.hbm [shape: f32[1,2048], index: 0, kind: input, shape index: {}, may-alias: {0,1}]   ;;  %s119_s1 = inlined_call_operand.hbm [shape: f32[1,2048], index: 1, kind: output, shape index: {}, may-alias: {0,1}]  }
   0x1   :  { %7 = vsyncpa [#allocation4], 0  ;;  %s13_s8 = sshll.u32 %s118_s0, 4  ;;  %s100_s9 = smov [#allocation2]   ;;  %s14_s8 = int_to_ptr.hbm [resolvable:$true] %s13_s8 }
   0x2   :  { %s15_s10 = sshll.u32 %s100_s9, 4  ;;  %s16_s10 = int_to_ptr.vmem [resolvable:$true] %s15_s10 }
   0x3   :  { %18 = dma.hbm_to_vmem [thread:$0]  %s14_s8, 256, %s16_s10, [#allocation3]  }
   0x4   :  { %96 = dma.done.wait [#allocation3], 256  }
   0x5   :  { %97 = vsyncadd [#allocation3], 4294967040  ;;  %s101_s11 = smov [#allocation5]   ;;  %s36_s15 = sshll.u32 %s119_s1, 4  ;;  %v23_v0 = vld [vmem:[#allocation2] sm:$0xff]  ;;  %v24_v1 = vld [vmem:[#allocation2 + $0x8] sm:$0xff]  ;;  %s37_s15 = int_to_ptr.hbm [resolvable:$true] %s36_s15 }
   0x6   :  { %s34_s12 = sshll.u32 %s101_s11, 4  ;;  %v25_v2 = vmax.f32 %v23_v0, 0.0  ;;  %v26_v3 = vmax.f32 %v24_v1, 0.0  ;;  %s35_s12 = int_to_ptr.vmem [resolvable:$true] %s34_s12 }
   0x8   :  { %27 = vst [vmem:[#allocation5] sm:$0xff] %v25_v2 }
   0x9   :  { %28 = vst [vmem:[#allocation5 + $0x8] sm:$0xff] %v26_v3 }
   0xa   :  { %39 = dma.vmem_to_hbm [thread:$0]  %s35_s12, 256, %s37_s15, [#allocation4]  }
   0xb   :  { %98 = dma.done.wait [#allocation4], 256  }
   0xc   :  { %99 = vsyncadd [#allocation4], 4294967040 }
   0xd   :  { %44 = vsyncpa [#allocation3], 1 }
   0xe   :  { %45 = vsyncpa [#allocation4], 1 }

</bundles_post_ra>
